<compile_context>
chip_gen: v5e
topology: v5e:2x2
jax: 0.10.0
libtpu: 0.0.40
codegen_flags: <defaults>
</compile_context>

<pallas_src>
import functools
import math

import jax
import jax.numpy as jnp
from jax.experimental import pallas as pl
from jax.experimental.pallas import tpu as pltpu


def _round_up(x, m):
    return ((x + m - 1) // m) * m


def _pick_tile(n):
    """Points per grid step: multiple of 128 lanes, >= ~8 steps when possible,
    capped at 16384 (2 MiB input block; double-buffered blocks plus the
    (D, tile_n) temporaries stay well inside default scoped VMEM on
    v5e/v6e/v7x)."""
    t = _round_up(max(n // 8, 1), 128)
    return int(max(128, min(t, 16384)))


def _overlap_score_kernel(x_ref, w1_ref, b1_ref, w2_ref, b2_ref, out_ref):
    """Scores one tile of points.

    x_ref  : (tile_n, D) VMEM   raw features, natural HBM layout
    w1_ref : (D, D)      VMEM   Linear1 weight, PyTorch (out, in) layout
    b1_ref : (D, 1)      VMEM   Linear1 bias
    w2_ref : (D, 1)      VMEM   Linear2 weight column
    b2_ref : (1,)        SMEM   Linear2 bias scalar
    out_ref: (1, tile_n) VMEM   sigmoid scores, lane-dense
    """
    # One in-kernel transpose puts the point axis on the 128-lane axis; every
    # elementwise / EUP op and the output store then uses full vregs.
    xT = x_ref[...].astype(jnp.float32).T                      # (D, tile_n)

    # F.normalize(x, p=2, dim=-1) == x * rsqrt(max(sum(x^2), eps^2)), eps=1e-12.
    sumsq = jnp.sum(xT * xT, axis=0, keepdims=True)            # (1, tile_n)
    xn = xT * jax.lax.rsqrt(jnp.maximum(sumsq, 1e-24))         # EUP rsqrt

    # Linear(D, D) on the MXU; normalized operands + pinned f32 precision.
    h = jnp.dot(w1_ref[...], xn,
                preferred_element_type=jnp.float32,
                precision=jax.lax.Precision.HIGHEST)           # (D, tile_n)
    h = jnp.maximum(h + b1_ref[...], 0.0)                      # bias + ReLU

    # Linear(D, 1): single output row -> VPU multiply + sublane reduce
    # (avoids a second MXU round-trip at 1/128 output width).
    s = jnp.sum(h * w2_ref[...], axis=0, keepdims=True)        # (1, tile_n)
    out_ref[...] = jax.nn.sigmoid(s + b2_ref[0]).astype(out_ref.dtype)


def _scores_one(feat, w1, b1, w2, b2, tile_n):
    """feat: (N, D) float32 -> (N,) sigmoid scores via one pallas_call."""
    n, d = feat.shape
    grid = (pl.cdiv(n, tile_n),)
    cost = pl.CostEstimate(
        flops=int(n) * (2 * d * d + 6 * d),
        transcendentals=2 * int(n),                            # rsqrt + sigmoid
        bytes_accessed=int(n) * (d + 1) * 4 + (d * d + 3 * d + 1) * 4,
    )
    out = pl.pallas_call(
        _overlap_score_kernel,
        out_shape=jax.ShapeDtypeStruct((1, n), jnp.float32),
        grid=grid,
        in_specs=[
            pl.BlockSpec((tile_n, d), lambda i: (i, 0)),        # point tile
            pl.BlockSpec((d, d), lambda i: (0, 0)),             # W1 (resident)
            pl.BlockSpec((d, 1), lambda i: (0, 0)),             # b1 (resident)
            pl.BlockSpec((d, 1), lambda i: (0, 0)),             # w2 (resident)
            pl.BlockSpec(memory_space=pltpu.MemorySpace.SMEM),  # b2 scalar
        ],
        out_specs=pl.BlockSpec((1, tile_n), lambda i: (0, i)),  # lane-dense
        compiler_params=pltpu.CompilerParams(
            dimension_semantics=("parallel",)),
        cost_estimate=cost,
    )(feat, w1, b1, w2, b2)
    return out[0]


@functools.partial(jax.jit, static_argnames=("tile_x", "tile_y"))
def _forward(feat_x, feat_y, w1, b1, w2, b2, *, tile_x, tile_y):
    # Flattening the leading batch dim and the dtype cast fuse inside this jit
    # (no standalone HBM passes); each cloud goes straight into its own
    # pallas_call in natural (N, D) layout.
    fx = feat_x.reshape(-1, feat_x.shape[-1]).astype(jnp.float32)
    fy = feat_y.reshape(-1, feat_y.shape[-1]).astype(jnp.float32)
    sx = _scores_one(fx, w1, b1, w2, b2, tile_x)
    sy = _scores_one(fy, w1, b1, w2, b2, tile_y)
    return sx, sy


class OverlapPredictorNetPallas:
    """JAX/Pallas port of OverlapPredictorNet (overlap_feat_dim=32 default)."""

    def __init__(self, overlap_feat_dim=32, key=None):
        if key is None:
            key = jax.random.PRNGKey(0)
        d = overlap_feat_dim
        k1, k2, k3, k4 = jax.random.split(key, 4)
        bound = 1.0 / jnp.sqrt(d)
        # W1 kept in PyTorch (out, in) layout — exactly what the transposed
        # in-kernel compute wants (W1 @ x^T).
        self.w1 = jax.random.uniform(k1, (d, d), jnp.float32, -bound, bound)
        self.b1 = jax.random.uniform(k2, (d, 1), jnp.float32, -bound, bound)
        self.w2 = jax.random.uniform(k3, (d, 1), jnp.float32, -bound, bound)
        self.b2 = jax.random.uniform(k4, (1,), jnp.float32, -bound, bound)

    def __call__(self, overlap_feat_x, overlap_feat_y):
        nx = math.prod(overlap_feat_x.shape[:-1])
        ny = math.prod(overlap_feat_y.shape[:-1])
        return _forward(overlap_feat_x, overlap_feat_y,
                        self.w1, self.b1, self.w2, self.b2,
                        tile_x=_pick_tile(nx), tile_y=_pick_tile(ny))


def _reference(feat, net):
    """Pure-JAX reference matching the PyTorch forward exactly."""
    f2 = feat.reshape(-1, feat.shape[-1]).astype(jnp.float32)
    nrm = jnp.maximum(jnp.linalg.norm(f2, axis=-1, keepdims=True), 1e-12)
    xn = f2 / nrm
    h = jnp.maximum(
        jnp.dot(xn, net.w1.T, precision=jax.lax.Precision.HIGHEST)
        + net.b1[:, 0], 0.0)
    s = jnp.dot(h, net.w2, precision=jax.lax.Precision.HIGHEST) + net.b2
    return jax.nn.sigmoid(s)[:, 0]


if __name__ == "__main__":
    key = jax.random.PRNGKey(0)
    k_param, kx, ky = jax.random.split(key, 3)

    D = 32            # overlap_feat_dim
    NX, NY = 1000, 200  # non-multiples of the tile -> exercises ragged blocks

    net = OverlapPredictorNetPallas(overlap_feat_dim=D, key=k_param)

    overlap_feat_x = jax.random.normal(kx, (1, NX, D), jnp.float32)
    overlap_feat_y = jax.random.normal(ky, (1, NY, D), jnp.float32)

    score_x, score_y = net(overlap_feat_x, overlap_feat_y)
    score_x = jax.block_until_ready(score_x)
    score_y = jax.block_until_ready(score_y)

    ref_x = _reference(overlap_feat_x, net)
    ref_y = _reference(overlap_feat_y, net)

    assert score_x.shape == (NX,) and score_y.shape == (NY,)
    assert bool(jnp.all(jnp.isfinite(score_x))) and bool(jnp.all(jnp.isfinite(score_y)))
    assert jnp.allclose(score_x, ref_x, atol=1e-5, rtol=1e-5)
    assert jnp.allclose(score_y, ref_y, atol=1e-5, rtol=1e-5)

    print("KERNEL_OK")
</pallas_src>

<mosaic_0001>
module attributes {stable_mosaic.version = 11 : i64} {
  func.func @_overlap_score_kernel(%arg0: i32, %arg1: memref<128x32xf32, #tpu.memory_space<vmem>>, %arg2: memref<32x32xf32, #tpu.memory_space<vmem>>, %arg3: memref<32x1xf32, #tpu.memory_space<vmem>>, %arg4: memref<32x1xf32, #tpu.memory_space<vmem>>, %arg5: memref<1xf32, #tpu.memory_space<smem>>, %arg6: memref<1x128xf32, #tpu.memory_space<vmem>>) attributes {dimension_semantics = [#tpu.dimension_semantics<parallel>], iteration_bounds = array<i64: 8>, scalar_prefetch = 0 : i64, scratch_operands = 0 : i64, tpu.core_type = #tpu.core_type<tc>, window_params = [{transform_indices = @transform_0, window_bounds = array<i64: 128, 32>}, {pipeline_mode = #tpu.pipeline_mode<synchronous>, transform_indices = @transform_1, window_bounds = array<i64: 32, 32>}, {pipeline_mode = #tpu.pipeline_mode<synchronous>, transform_indices = @transform_2, window_bounds = array<i64: 32, 1>}, {pipeline_mode = #tpu.pipeline_mode<synchronous>, transform_indices = @transform_3, window_bounds = array<i64: 32, 1>}, {transform_indices = @transform_4, window_bounds = array<i64: 1>}, {transform_indices = @transform_5, window_bounds = array<i64: 1, 128>}]} {
    %c0 = arith.constant 0 : index
    %c0_0 = arith.constant 0 : index
    %0 = vector.load %arg1[%c0, %c0_0] : memref<128x32xf32, #tpu.memory_space<vmem>>, vector<128x32xf32>
    %1 = tpu.transpose %0, [1, 0] : vector<128x32xf32> -> vector<32x128xf32>
    %2 = arith.mulf %1, %1 : vector<32x128xf32>
    %cst = arith.constant dense<0.000000e+00> : vector<128xf32>
    %3 = vector.multi_reduction <add>, %2, %cst [0] : vector<32x128xf32> to vector<128xf32>
    %4 = vector.shape_cast %3 : vector<128xf32> to vector<1x128xf32>
    %cst_1 = arith.constant 1.000000e-24 : f32
    %5 = vector.broadcast %cst_1 : f32 to vector<1x128xf32>
    %6 = arith.maximumf %4, %5 : vector<1x128xf32>
    %7 = math.rsqrt %6 : vector<1x128xf32>
    %8 = vector.broadcast %7 : vector<1x128xf32> to vector<32x128xf32>
    %9 = arith.mulf %1, %8 : vector<32x128xf32>
    %c0_2 = arith.constant 0 : index
    %c0_3 = arith.constant 0 : index
    %10 = vector.load %arg2[%c0_2, %c0_3] : memref<32x32xf32, #tpu.memory_space<vmem>>, vector<32x32xf32>
    %cst_4 = arith.constant dense<0.000000e+00> : vector<32x128xf32>
    %11 = tpu.matmul %10, %9, %cst_4 {dimension_numbers = #tpu.dot_dimension_numbers<[1], [0], [0], [1], [0, 0, 1, 1], [], []>, precision = #tpu.contract_precision<fp32>} : vector<32x32xf32>, vector<32x128xf32>, vector<32x128xf32> -> vector<32x128xf32>
    %c0_5 = arith.constant 0 : index
    %c0_6 = arith.constant 0 : index
    %12 = vector.load %arg3[%c0_5, %c0_6] : memref<32x1xf32, #tpu.memory_space<vmem>>, vector<32x1xf32>
    %13 = vector.broadcast %12 : vector<32x1xf32> to vector<32x128xf32>
    %14 = arith.addf %11, %13 : vector<32x128xf32>
    %cst_7 = arith.constant 0.000000e+00 : f32
    %15 = vector.broadcast %cst_7 : f32 to vector<32x128xf32>
    %16 = arith.maximumf %14, %15 : vector<32x128xf32>
    %c0_8 = arith.constant 0 : index
    %c0_9 = arith.constant 0 : index
    %17 = vector.load %arg4[%c0_8, %c0_9] : memref<32x1xf32, #tpu.memory_space<vmem>>, vector<32x1xf32>
    %18 = vector.broadcast %17 : vector<32x1xf32> to vector<32x128xf32>
    %19 = arith.mulf %16, %18 : vector<32x128xf32>
    %cst_10 = arith.constant dense<0.000000e+00> : vector<128xf32>
    %20 = vector.multi_reduction <add>, %19, %cst_10 [0] : vector<32x128xf32> to vector<128xf32>
    %21 = vector.shape_cast %20 : vector<128xf32> to vector<1x128xf32>
    %c0_11 = arith.constant 0 : index
    %22 = memref.load %arg5[%c0_11] : memref<1xf32, #tpu.memory_space<smem>>
    %23 = vector.broadcast %22 : f32 to vector<1x128xf32>
    %24 = arith.addf %21, %23 : vector<1x128xf32>
    %25 = arith.negf %24 : vector<1x128xf32>
    %26 = math.exp %25 : vector<1x128xf32>
    %cst_12 = arith.constant 1.000000e+00 : f32
    %27 = vector.broadcast %cst_12 : f32 to vector<1x128xf32>
    %28 = arith.addf %27, %26 : vector<1x128xf32>
    %29 = arith.divf %27, %28 : vector<1x128xf32>
    %c0_13 = arith.constant 0 : index
    %c0_14 = arith.constant 0 : index
    %30 = vector.load %arg6[%c0_13, %c0_14] : memref<1x128xf32, #tpu.memory_space<vmem>>, vector<1x128xf32>
    tpu.vector_store %arg6[%c0_13, %c0_14], %29 {strides = array<i32>} : memref<1x128xf32, #tpu.memory_space<vmem>>, vector<1x128xf32>,
    return
  }
  func.func @transform_0(%arg0: i32) -> (i32, i32) {
    %c0_i32 = arith.constant 0 : i32
    %c0_i32_0 = arith.constant 0 : i32
    return %arg0, %c0_i32 : i32, i32
  }
  func.func @transform_1(%arg0: i32) -> (i32, i32) {
    %c0_i32 = arith.constant 0 : i32
    %c0_i32_0 = arith.constant 0 : i32
    %c0_i32_1 = arith.constant 0 : i32
    return %c0_i32, %c0_i32_0 : i32, i32
  }
  func.func @transform_2(%arg0: i32) -> (i32, i32) {
    %c0_i32 = arith.constant 0 : i32
    %c0_i32_0 = arith.constant 0 : i32
    %c0_i32_1 = arith.constant 0 : i32
    return %c0_i32, %c0_i32_0 : i32, i32
  }
  func.func @transform_3(%arg0: i32) -> (i32, i32) {
    %c0_i32 = arith.constant 0 : i32
    %c0_i32_0 = arith.constant 0 : i32
    %c0_i32_1 = arith.constant 0 : i32
    return %c0_i32, %c0_i32_0 : i32, i32
  }
  func.func @transform_4(%arg0: i32) -> i32 {
    %c0_i32 = arith.constant 0 : i32
    %c0_i32_0 = arith.constant 0 : i32
    return %c0_i32 : i32
  }
  func.func @transform_5(%arg0: i32) -> (i32, i32) {
    %c0_i32 = arith.constant 0 : i32
    %c0_i32_0 = arith.constant 0 : i32
    return %c0_i32, %arg0 : i32, i32
  }
}

module attributes {stable_mosaic.version = 11 : i64} {
  func.func @_overlap_score_kernel(%arg0: i32, %arg1: memref<128x32xf32, #tpu.memory_space<vmem>>, %arg2: memref<32x32xf32, #tpu.memory_space<vmem>>, %arg3: memref<32x1xf32, #tpu.memory_space<vmem>>, %arg4: memref<32x1xf32, #tpu.memory_space<vmem>>, %arg5: memref<1xf32, #tpu.memory_space<smem>>, %arg6: memref<1x128xf32, #tpu.memory_space<vmem>>) attributes {dimension_semantics = [#tpu.dimension_semantics<parallel>], iteration_bounds = array<i64: 2>, scalar_prefetch = 0 : i64, scratch_operands = 0 : i64, tpu.core_type = #tpu.core_type<tc>, window_params = [{transform_indices = @transform_0, window_bounds = array<i64: 128, 32>}, {pipeline_mode = #tpu.pipeline_mode<synchronous>, transform_indices = @transform_1, window_bounds = array<i64: 32, 32>}, {pipeline_mode = #tpu.pipeline_mode<synchronous>, transform_indices = @transform_2, window_bounds = array<i64: 32, 1>}, {pipeline_mode = #tpu.pipeline_mode<synchronous>, transform_indices = @transform_3, window_bounds = array<i64: 32, 1>}, {transform_indices = @transform_4, window_bounds = array<i64: 1>}, {transform_indices = @transform_5, window_bounds = array<i64: 1, 128>}]} {
    %c0 = arith.constant 0 : index
    %c0_0 = arith.constant 0 : index
    %0 = vector.load %arg1[%c0, %c0_0] : memref<128x32xf32, #tpu.memory_space<vmem>>, vector<128x32xf32>
    %1 = tpu.transpose %0, [1, 0] : vector<128x32xf32> -> vector<32x128xf32>
    %2 = arith.mulf %1, %1 : vector<32x128xf32>
    %cst = arith.constant dense<0.000000e+00> : vector<128xf32>
    %3 = vector.multi_reduction <add>, %2, %cst [0] : vector<32x128xf32> to vector<128xf32>
    %4 = vector.shape_cast %3 : vector<128xf32> to vector<1x128xf32>
    %cst_1 = arith.constant 1.000000e-24 : f32
    %5 = vector.broadcast %cst_1 : f32 to vector<1x128xf32>
    %6 = arith.maximumf %4, %5 : vector<1x128xf32>
    %7 = math.rsqrt %6 : vector<1x128xf32>
    %8 = vector.broadcast %7 : vector<1x128xf32> to vector<32x128xf32>
    %9 = arith.mulf %1, %8 : vector<32x128xf32>
    %c0_2 = arith.constant 0 : index
    %c0_3 = arith.constant 0 : index
    %10 = vector.load %arg2[%c0_2, %c0_3] : memref<32x32xf32, #tpu.memory_space<vmem>>, vector<32x32xf32>
    %cst_4 = arith.constant dense<0.000000e+00> : vector<32x128xf32>
    %11 = tpu.matmul %10, %9, %cst_4 {dimension_numbers = #tpu.dot_dimension_numbers<[1], [0], [0], [1], [0, 0, 1, 1], [], []>, precision = #tpu.contract_precision<fp32>} : vector<32x32xf32>, vector<32x128xf32>, vector<32x128xf32> -> vector<32x128xf32>
    %c0_5 = arith.constant 0 : index
    %c0_6 = arith.constant 0 : index
    %12 = vector.load %arg3[%c0_5, %c0_6] : memref<32x1xf32, #tpu.memory_space<vmem>>, vector<32x1xf32>
    %13 = vector.broadcast %12 : vector<32x1xf32> to vector<32x128xf32>
    %14 = arith.addf %11, %13 : vector<32x128xf32>
    %cst_7 = arith.constant 0.000000e+00 : f32
    %15 = vector.broadcast %cst_7 : f32 to vector<32x128xf32>
    %16 = arith.maximumf %14, %15 : vector<32x128xf32>
    %c0_8 = arith.constant 0 : index
    %c0_9 = arith.constant 0 : index
    %17 = vector.load %arg4[%c0_8, %c0_9] : memref<32x1xf32, #tpu.memory_space<vmem>>, vector<32x1xf32>
    %18 = vector.broadcast %17 : vector<32x1xf32> to vector<32x128xf32>
    %19 = arith.mulf %16, %18 : vector<32x128xf32>
    %cst_10 = arith.constant dense<0.000000e+00> : vector<128xf32>
    %20 = vector.multi_reduction <add>, %19, %cst_10 [0] : vector<32x128xf32> to vector<128xf32>
    %21 = vector.shape_cast %20 : vector<128xf32> to vector<1x128xf32>
    %c0_11 = arith.constant 0 : index
    %22 = memref.load %arg5[%c0_11] : memref<1xf32, #tpu.memory_space<smem>>
    %23 = vector.broadcast %22 : f32 to vector<1x128xf32>
    %24 = arith.addf %21, %23 : vector<1x128xf32>
    %25 = arith.negf %24 : vector<1x128xf32>
    %26 = math.exp %25 : vector<1x128xf32>
    %cst_12 = arith.constant 1.000000e+00 : f32
    %27 = vector.broadcast %cst_12 : f32 to vector<1x128xf32>
    %28 = arith.addf %27, %26 : vector<1x128xf32>
    %29 = arith.divf %27, %28 : vector<1x128xf32>
    %c0_13 = arith.constant 0 : index
    %c0_14 = arith.constant 0 : index
    %30 = vector.load %arg6[%c0_13, %c0_14] : memref<1x128xf32, #tpu.memory_space<vmem>>, vector<1x128xf32>
    tpu.vector_store %arg6[%c0_13, %c0_14], %29 {strides = array<i32>} : memref<1x128xf32, #tpu.memory_space<vmem>>, vector<1x128xf32>,
    return
  }
  func.func @transform_0(%arg0: i32) -> (i32, i32) {
    %c0_i32 = arith.constant 0 : i32
    %c0_i32_0 = arith.constant 0 : i32
    return %arg0, %c0_i32 : i32, i32
  }
  func.func @transform_1(%arg0: i32) -> (i32, i32) {
    %c0_i32 = arith.constant 0 : i32
    %c0_i32_0 = arith.constant 0 : i32
    %c0_i32_1 = arith.constant 0 : i32
    return %c0_i32, %c0_i32_0 : i32, i32
  }
  func.func @transform_2(%arg0: i32) -> (i32, i32) {
    %c0_i32 = arith.constant 0 : i32
    %c0_i32_0 = arith.constant 0 : i32
    %c0_i32_1 = arith.constant 0 : i32
    return %c0_i32, %c0_i32_0 : i32, i32
  }
  func.func @transform_3(%arg0: i32) -> (i32, i32) {
    %c0_i32 = arith.constant 0 : i32
    %c0_i32_0 = arith.constant 0 : i32
    %c0_i32_1 = arith.constant 0 : i32
    return %c0_i32, %c0_i32_0 : i32, i32
  }
  func.func @transform_4(%arg0: i32) -> i32 {
    %c0_i32 = arith.constant 0 : i32
    %c0_i32_0 = arith.constant 0 : i32
    return %c0_i32 : i32
  }
  func.func @transform_5(%arg0: i32) -> (i32, i32) {
    %c0_i32 = arith.constant 0 : i32
    %c0_i32_0 = arith.constant 0 : i32
    return %c0_i32, %arg0 : i32, i32
  }
}

</mosaic_0001>

<bundles_post_ra>
// kernel: _forward.3
= control target key start
LH: loop header
LB: loop body
LE: loop exit
PB: predicated region body
PF: predicated region fallthrough
CT: control target
= control target key end

     0   :  { %s1153_s0 = inlined_call_operand.vmem [shape: f32[200,32], index: 0, kind: input, shape index: {}]   ;;  %s1154_s1 = inlined_call_operand.vmem [shape: f32[32,32], index: 1, kind: input, shape index: {}]   ;;  %s1155_s2 = inlined_call_operand.vmem [shape: f32[32,1], index: 2, kind: input, shape index: {}]   ;;  %s1156_s3 = inlined_call_operand.vmem [shape: f32[32,1], index: 3, kind: input, shape index: {}]   ;;  %s1157_s4 = inlined_call_operand.<no memory space> [shape: f32[1], index: 4, kind: input, shape index: {}]   ;;  %s1158_s5 = inlined_call_operand.hbm [shape: f32[1,200], index: 5, kind: output, shape index: {}]  }
   0x1   :  { %10 = sst [smem:[#allocation2]] %s1157_s4 }
   0x2   :  { %11 = vsyncpa [#allocation4], 0 }
   0x3   :  { %13 = vsyncpa [#allocation4 + $0x1], 0  ;;  %s936_s20 = smov 0   ;;  %s938_s21 = smov 0  }
   0x4   :  { %s940_s22 = smov 0   ;;  %s942_s23 = smov 0  }
   0x5 LB: > { %s957_s4 = sadd.s32 4294967295, %s900_s23   ;;  %s772_s24 = sadd.s32 4294967294, %s900_s23   ;;  %s900_s23 = sphi %s942_s23, %s1164_s23   ;;  %s896_s22 = sphi %s940_s22, %s1163_s22   ;;  %s892_s21 = sphi %s938_s21, %s1162_s21   ;;  %s888_s20 = sphi %s936_s20, %s1161_s20  }
   0x6   : > { %s961_s25 = sadd.s32 1, %s900_s23   ;;  %s136_s26 = sadd.s32 1, %s896_s22 }
   0x7   : > { %s133_s27 = ssub.s32 %s900_s23, %s961_s25  ;;  %p146_p0 = scmp.ne.s32.totalorder %s896_s22, %s892_s21 }
   0x8   : > { %p134_p1 = scmp.eq.s32.totalorder %s133_s27, 0  ;;  %p147_p2 = scmp.eq.s32.totalorder %s957_s4, 1 }
   0x9   : > { %p152_p3 = scmp.ne.s32.totalorder %s892_s21, %s888_s20  ;;  %p153_p4 = scmp.eq.s32.totalorder %s772_s24, 1 }
   0xa   : > { %s972_s28 = scalar_select %p134_p1, %s896_s22, %s136_s26  }
   0xb   : > { %p974_p5 = por %p147_p2, %p146_p0  ;;  %p978_p6 = por %p153_p4, %p152_p3 }
   0xc   : > { %p775_p7 = scmp.ge.s32.totalorder %s900_s23, 1  ;;  %p200_p8 = scmp.lt.s32.totalorder %s900_s23, 3 }
   0xe   : > { %p201_p9 = pnand %p775_p7, %p200_p8 }
   0xf   : > { %s776_s6 = sshll.u32 (!%p201_p9), %s957_s4, 4  ;;  %s681_s18 = sld [smem:[#allocation2]] (!%p201_p9) }
  0x10   : > { %204 = sbr.rel (%p201_p9) target bundleno = 499 (0x1f3), region = 40  ;;  %p236_p10 = scmp.lt.s32.totalorder (!%p201_p9), %s776_s6, 24 }
  0x11   : > { %s229_s19 = sand.u32 (!%p201_p9), 1, %s892_s21   ;;  %s713_s27 = scalar_lea.hbm (!%p201_p9), %s1158_s5, %s957_s4 }
  0x12   : > { %s717_s8 = sshll.u32 (!%p201_p9), %s713_s27, 4  ;;  %s705_s9 = scalar_lea.sflag (!%p201_p9), [#allocation4], %s229_s19  ;;  %s718_s8 = int_to_ptr.hbm [resolvable:$true] %s717_s8 }
  0x13   : > { %s852_s4 = sshra.s32 (!%p201_p9), %s718_s8, 4  ;;  %s858_s13 = scalar_lea.hbm (!%p201_p9), %s1158_s5, 2  ;;  %s853_s4 = int_to_ptr.hbm [resolvable:$true] %s852_s4 }
  0x14   : > { %p859_p0 = scmp.lt.s32.totalorder (!%p201_p9), %s853_s4, %s1158_s5 }
  0x15   : > { %s1166_s6 = smov (!%p236_p10, %s776_s6), 24  ;;  %v323_v34 = vld [vmem:[%s1154_s1 + $0x10] sm:$0xff]  ;;  %vm349_vm0 = vcmask 261120   ;;  %v324_v41 = vld [vmem:[%s1154_s1 + $0x18] sm:$0xff]  ;;  %v321_v44 = vld [vmem:[%s1154_s1] sm:$0xff]  ;;  %v902_v48 = vmov 0  }
  0x16   : > { %s777_s7 = sshll.u32 %s1166_s6, 3  ;;  %v357_v36 = vsel %vm349_vm0, %v323_v34, 0  ;;  %v360_v45 = vsel %vm349_vm0, %v324_v41, 0  ;;  %v325_v46 = vld [vmem:[%s1155_s2] sm:$0xff]  ;;  %829 = vset.pattern.permute.xlu1 %v902_v48  ;;  %830 = vset.pattern.permute.xlu2 %v902_v48  ;;  %v351_v49 = vsel %vm349_vm0, %v321_v44, 0  ;;  %v646_v34 = vld [vmem:[%s1156_s3 + $0x10] sm:$0xff] }
  0x17   : > { %s988_s10 = scalar_lea.vmem %s1153_s0, %s777_s7  ;;  %v1010_v39 = vand.u32 4294901760, %v357_v36  ;;  %331 = vperm.xlu1 %829, %v325_v46   ;;  %v1027_v52 = vand.u32 4294901760, %v360_v45  ;;  %v1029_v57 = vand.u32 4294901760, %v351_v49  ;;  %s230_s6 = scalar_lea.vmem [#allocation3], %s229_s19 }
  0x18   : > { %v245_v0 = vld [vmem:[%s988_s10] sm:$0xff]  ;;  %v246_v1 = vld [vmem:[%s988_s10 + $0x8] sm:$0xff]  ;;  %v247_v2 = vld [vmem:[%s988_s10 + $0x10] sm:$0xff]  ;;  %s715_s7 = sshll.u32 %s230_s6, 4  ;;  %s716_s7 = int_to_ptr.vmem [resolvable:$true] %s715_s7 }
  0x19   : > { %261 = vxpose.xlu0.b32.start [1/16] (narrow) %v245_v0, 32  ;;  %v248_v3 = vld [vmem:[%s988_s10 + $0x18] sm:$0xff]  ;;  %v249_v4 = vld [vmem:[%s988_s10 + $0x20] sm:$0xff]  ;;  %v250_v5 = vld [vmem:[%s988_s10 + $0x28] sm:$0xff]  ;;  %v1016_v43 = vsub.f32 %v357_v36, %v1010_v39  ;;  %v1043_v63 = vsub.f32 %v360_v45, %v1027_v52 }
  0x1a   : > { %v251_v6 = vld [vmem:[%s988_s10 + $0x30] sm:$0xff]  ;;  %v252_v7 = vld [vmem:[%s988_s10 + $0x38] sm:$0xff]  ;;  %v253_v8 = vld [vmem:[%s988_s10 + $0x40] sm:$0xff] }
  0x1b   : > { %v254_v9 = vld [vmem:[%s988_s10 + $0x48] sm:$0xff]  ;;  %v255_v10 = vld [vmem:[%s988_s10 + $0x50] sm:$0xff]  ;;  %v256_v11 = vld [vmem:[%s988_s10 + $0x58] sm:$0xff]  ;;  %v400_v51 = vand.u32 4294901760, %v1016_v43 }
  0x1c   : > { %v257_v12 = vld [vmem:[%s988_s10 + $0x60] sm:$0xff]  ;;  %v258_v13 = vld [vmem:[%s988_s10 + $0x68] sm:$0xff]  ;;  %v259_v14 = vld [vmem:[%s988_s10 + $0x70] sm:$0xff] }
  0x1d   : > { %v260_v15 = vld [vmem:[%s988_s10 + $0x78] sm:$0xff]  ;;  %v401_v62 = vsub.f32 %v1016_v43, %v400_v51  ;;  %v322_v0 = vld [vmem:[%s1154_s1 + $0x8] sm:$0xff]  ;;  %s854_s10 = scalar_lea.hbm %s853_s4, 1 }
  0x1e   : > { %v645_v36 = vld [vmem:[%s1156_s3 + $0x8] sm:$0xff]  ;;  %p855_p11 = scmp.ne.s32.totalorder %s853_s4, %s854_s10  ;;  %p860_p1 = scmp.lt.s32.totalorder %s858_s13, %s854_s10 }
  0x20   : > { %p856_p12 = pnand %p855_p11, %p974_p5  ;;  %p861_p2 = por %p860_p1, %p859_p0 }
  0x21   : > { %262 = vxpose.xlu0.b32.cont [2/16] (narrow) %v246_v1, 32 }
  0x22   : > { %p857_p13 = pneg %p856_p12 }
  0x24   : > { %p862_p3 = pnand %p861_p2, %p857_p13 }
  0x29   : > { %263 = vxpose.xlu0.b32.cont [3/16] (narrow) %v247_v2, 32 }
  0x31   : > { %264 = vxpose.xlu0.b32.cont [4/16] (narrow) %v248_v3, 32 }
  0x39   : > { %265 = vxpose.xlu0.b32.cont [5/16] (narrow) %v249_v4, 32  ;;  %v326_v4 = vld [vmem:[%s1155_s2 + $0x8] sm:$0xff] }
  0x3a   : > { %336 = vperm.xlu1 %829, %v326_v4  }
  0x41   : > { %266 = vxpose.xlu0.b32.cont [6/16] (narrow) %v250_v5, 32 }
  0x49   : > { %267 = vxpose.xlu0.b32.cont [7/16] (narrow) %v251_v6, 32  ;;  %v1058_v6 = vsub.f32 %v351_v49, %v1029_v57 }
  0x51   : > { %268 = vxpose.xlu0.b32.cont [8/16] (narrow) %v252_v7, 32 }
  0x59   : > { %269 = vxpose.xlu0.b32.cont [9/16] (narrow) %v253_v8, 32 }
  0x61   : > { %270 = vxpose.xlu0.b32.cont [10/16] (narrow) %v254_v9, 32 }
  0x69   : > { %271 = vxpose.xlu0.b32.cont [11/16] (narrow) %v255_v10, 32  ;;  %v354_v10 = vsel %vm349_vm0, %v322_v0, 0 }
  0x71   : > { %272 = vxpose.xlu0.b32.cont [12/16] (narrow) %v256_v11, 32  ;;  %v402_v11 = vand.u32 4294901760, %v401_v62 }
  0x79   : > { %273 = vxpose.xlu0.b32.cont [13/16] (narrow) %v257_v12, 32  ;;  %v408_v12 = vand.u32 4294901760, %v1043_v63 }
  0x81   : > { %274 = vxpose.xlu0.b32.cont [14/16] (narrow) %v258_v13, 32 }
  0x89   : > { %275 = vxpose.xlu0.b32.cont [15/16] (narrow) %v259_v14, 32 }
  0x91   : > { %276 = vxpose.xlu0.b32.end [16/16] (narrow) %v260_v15, 32 }
  0xbd   : > { %v277_v16 = vpop.trf.xlu0 }
  0xbe   : > { %v293_v20 = vmul.f32 %v277_v16, %v277_v16 }
  0xc5   : > { %v278_v17 = vpop.trf.xlu0 }
  0xc6   : > { %v294_v19 = vmul.f32 %v278_v17, %v278_v17 }
  0xc8   : > { %v297_v22 = vadd.f32 %v294_v19, %v293_v20  ;;  %v409_v20 = vsub.f32 %v1043_v63, %v408_v12 }
  0xcd   : > { %v279_v18 = vpop.trf.xlu0 }
  0xce   : > { %v295_v21 = vmul.f32 %v279_v18, %v279_v18 }
  0xd0   : > { %v298_v24 = vadd.f32 %v297_v22, %v295_v21 }
  0xd5   : > { %v280_v23 = vpop.trf.xlu0 }
  0xd6   : > { %v296_v25 = vmul.f32 %v280_v23, %v280_v23 }
  0xd8   : > { %v299_v26 = vadd.f32 %v298_v24, %v296_v25 }
  0xda   : > { %v300_v27 = vrot.slane %v299_v26, 4 }
  0xdc   : > { %v301_v28 = vadd.f32 %v300_v27, %v299_v26  ;;  %v410_v26 = vand.u32 4294901760, %v409_v20 }
  0xde   : > { %v302_v29 = vrot.slane %v301_v28, 2 }
  0xe0   : > { %v303_v30 = vadd.f32 %v302_v29, %v301_v28 }
  0xe2   : > { %v304_v31 = vrot.slane %v303_v30, 1 }
  0xe4   : > { %v305_v32 = vadd.f32 %v304_v31, %v303_v30  ;;  %v644_v30 = vld [vmem:[%s1156_s3] sm:$0xff] }
  0xe5   : > { %650 = vperm.xlu1 %829, %v644_v30  }
  0xe6   : > { %v306_v33 = vmax.f32 %v305_v32, 1e-24  ;;  %v327_v32 = vld [vmem:[%s1155_s2 + $0x10] sm:$0xff] }
  0xe7   : > { %341 = vperm.xlu2 %830, %v327_v32  }
  0xe8   : > { %832 = vrsqrt.f32 %v306_v33  ;;  %vm313_vm2 = vweird.f32 %v306_v33 }
  0xed   : > { %660 = vperm.xlu1 %829, %v646_v34  }
  0xee   : > { %v833_v35 = vpop.eup %832 }
  0xef   : > { %v308_v37 = vmul.f32 %v833_v35, %v306_v33  ;;  %vm314_vm1 = vweird.f32 %v833_v35 }
  0xf0   : > { %vm315_vm3 = vmor %vm313_vm2, %vm314_vm1 }
  0xf1   : > { %v309_v38 = vmul.f32 %v833_v35, %v308_v37  ;;  %v647_v37 = vld [vmem:[%s1156_s3 + $0x18] sm:$0xff] }
  0xf3   : > { %v310_v40 = vmul.f32 0.5, %v309_v38 }
  0xf5   : > { %v311_v42 = vsub.f32 1.5, %v310_v40 }
  0xf7   : > { %v312_v47 = vmul.f32 %v833_v35, %v311_v42 }
  0xf8   : > { %831 = vset.pattern.permute.xlu0 %v902_v48 }
  0xf9   : > { %v316_v50 = vsel %vm315_vm3, %v833_v35, %v312_v47  ;;  %v328_v35 = vld [vmem:[%s1155_s2 + $0x18] sm:$0xff]  ;;  %v332_v47 = vpop.permute.xlu1 %331 }
  0xfa   : > { %v317_v53 = vmul.f32 %v316_v50, %v277_v16  ;;  %v318_v54 = vmul.f32 %v316_v50, %v278_v17  ;;  %v319_v55 = vmul.f32 %v316_v50, %v279_v18  ;;  %v320_v56 = vmul.f32 %v316_v50, %v280_v23  ;;  %346 = vperm.xlu2 %830, %v328_v35  }
  0xfb   : > { %v384_v16 = vand.u32 4294901760, %v1058_v6  ;;  %v1067_v17 = vand.u32 4294901760, %v354_v10 }
  0xfc   : > { %v1031_v58 = vand.u32 4294901760, %v320_v56  ;;  %v1033_v59 = vand.u32 4294901760, %v319_v55  ;;  %v1035_v60 = vand.u32 4294901760, %v318_v54  ;;  %v1037_v61 = vand.u32 4294901760, %v317_v53 }
  0xfd   : > { %v385_v23 = vsub.f32 %v1058_v6, %v384_v16  ;;  %v391_v24 = vsub.f32 %v354_v10, %v1067_v17 }
  0xfe   : > { %v428_v1 = vsub.f32 %v320_v56, %v1031_v58  ;;  %375 = vmatpush.msra.mxu0 %v1031_v58  ;;  %781 = vmatpush.msra.mxu2 %v1031_v58  ;;  %v434_v2 = vsub.f32 %v319_v55, %v1033_v59  ;;  %v440_v3 = vsub.f32 %v318_v54, %v1035_v60 }
  0xff   : > { %v446_v5 = vsub.f32 %v317_v53, %v1037_v61  ;;  %v386_v28 = vand.u32 4294901760, %v385_v23  ;;  %v392_v29 = vand.u32 4294901760, %v391_v24 }
 0x100   : > { %377 = vmatpush.msra.mxu0 %v1033_v59  ;;  %782 = vmatpush.msra.mxu2 %v1033_v59  ;;  %v429_v7 = vand.u32 4294901760, %v428_v1  ;;  %v435_v8 = vand.u32 4294901760, %v434_v2  ;;  %v441_v9 = vand.u32 4294901760, %v440_v3 }
 0x101   : > { %v447_v15 = vand.u32 4294901760, %v446_v5  ;;  %v393_v31 = vsub.f32 %v391_v24, %v392_v29  ;;  %v337_v53 = vpop.permute.xlu1 %336 }
 0x102   : > { %379 = vmatpush.msra.mxu0 %v1035_v60  ;;  %783 = vmatpush.msra.mxu2 %v1035_v60  ;;  %v430_v13 = vsub.f32 %v428_v1, %v429_v7  ;;  %v436_v14 = vsub.f32 %v434_v2, %v435_v8  ;;  %v442_v19 = vsub.f32 %v440_v3, %v441_v9 }
 0x103   : > { %v448_v22 = vsub.f32 %v446_v5, %v447_v15  ;;  %v394_v33 = vand.u32 4294901760, %v393_v31  ;;  %655 = vperm.xlu2 %830, %v645_v36  }
 0x104   : > { %381 = vmatpush.msra.mxu0 %v1037_v61  ;;  %784 = vmatpush.msra.mxu2 %v1037_v61  ;;  %v431_v18 = vand.u32 4294901760, %v430_v13  ;;  %v437_v21 = vand.u32 4294901760, %v436_v14  ;;  %v443_v25 = vand.u32 4294901760, %v442_v19 }
 0x105   : > { %403 = vmatmul.f32.vlgmr.msra.gmra.mxu2 %v402_v11  ;;  %v449_v27 = vand.u32 4294901760, %v448_v22  ;;  %387 = vmatmul.f32.vlgmr.msra.gmra.mxu0 %v386_v28 }
 0x106   : > { %573 = vmatpush.msrb.mxu0 %v429_v7  ;;  %482 = vmatpush.msrb.mxu2 %v428_v1 }
 0x107   : > { %432 = vmatpush.msra.mxu1 %v431_v18  ;;  %785 = vmatpush.msra.mxu3 %v431_v18 }
 0x108   : > { %577 = vmatpush.msrb.mxu0 %v435_v8  ;;  %485 = vmatpush.msrb.mxu2 %v434_v2 }
 0x109   : > { %438 = vmatpush.msra.mxu1 %v437_v21  ;;  %786 = vmatpush.msra.mxu3 %v437_v21 }
 0x10a   : > { %581 = vmatpush.msrb.mxu0 %v441_v9  ;;  %488 = vmatpush.msrb.mxu2 %v440_v3 }
 0x10b   : > { %444 = vmatpush.msra.mxu1 %v443_v25  ;;  %787 = vmatpush.msra.mxu3 %v443_v25 }
 0x10c   : > { %585 = vmatpush.msrb.mxu0 %v447_v15  ;;  %491 = vmatpush.msrb.mxu2 %v446_v5 }
 0x10d   : > { %450 = vmatpush.msra.mxu1 %v449_v27  ;;  %788 = vmatpush.msra.mxu3 %v449_v27 }
 0x10e   : > { %411 = vmatmul.f32.gmra.mxu2 %v410_v26  ;;  %460 = vmatmul.f32.vlgmr.msra.gmra.mxu3 %v1010_v39 }
 0x10f   : > { %616 = vmatpush.msrb.mxu1 %v1031_v58  ;;  %526 = vmatpush.msrb.mxu3 %v1031_v58 }
 0x110   : > { %452 = vmatmul.f32.vlgmr.msra.gmra.mxu1 %v1029_v57  ;;  %395 = vmatmul.f32.gmra.mxu0 %v394_v33 }
 0x111   : > { %618 = vmatpush.msrb.mxu1 %v1033_v59  ;;  %528 = vmatpush.msrb.mxu3 %v1033_v59 }
 0x112   : > { %665 = vperm.xlu2 %830, %v647_v37  }
 0x113   : > { %620 = vmatpush.msrb.mxu1 %v1035_v60  ;;  %530 = vmatpush.msrb.mxu3 %v1035_v60 }
 0x115   : > { %622 = vmatpush.msrb.mxu1 %v1037_v61  ;;  %532 = vmatpush.msrb.mxu3 %v1037_v61 }
 0x116   : > { %494 = vmatmul.f32.vlgmr.msrb.gmra.mxu2 %v1058_v6  ;;  %464 = vmatmul.f32.gmra.mxu3 %v1027_v52 }
 0x118   : > { %456 = vmatmul.f32.gmra.mxu1 %v1067_v17  ;;  %587 = vmatmul.f32.vlgmr.msrb.gmra.mxu0 %v1029_v57 }
 0x11e   : > { %499 = vmatmul.f32.gmra.mxu2 %v391_v24  ;;  %536 = vmatmul.f32.vlgmr.msrb.gmra.mxu3 %v384_v16 }
 0x120   : > { %624 = vmatmul.f32.vlgmr.msrb.gmra.mxu1 %v1029_v57  ;;  %591 = vmatmul.f32.gmra.mxu0 %v1067_v17 }
 0x126   : > { %504 = vmatmul.f32.gmra.mxu2 %v1016_v43  ;;  %542 = vmatmul.f32.gmra.mxu3 %v392_v29 }
 0x128   : > { %628 = vmatmul.f32.gmra.mxu1 %v1067_v17  ;;  %595 = vmatmul.f32.gmra.mxu0 %v1010_v39 }
 0x12e   : > { %509 = vmatmul.f32.gmra.mxu2 %v1043_v63  ;;  %548 = vmatmul.f32.gmra.mxu3 %v400_v51 }
 0x130   : > { %632 = vmatmul.f32.gmra.mxu1 %v1010_v39  ;;  %599 = vmatmul.f32.gmra.mxu0 %v1027_v52 }
 0x136   : > { %554 = vmatmul.f32.gmra.mxu3 %v408_v12 }
 0x138   : > { %636 = vmatmul.f32.gmra.mxu1 %v1027_v52 }
 0x141   : > { %v342_v55 = vpop.permute.xlu2 %341 }
 0x154   : > { %v347_v4 = vpop.permute.xlu2 %346 }
 0x157   : > { %v651_v13 = vpop.permute.xlu1 %650 }
 0x15d   : > { %v656_v20 = vpop.permute.xlu2 %655 }
 0x15f   : > { %v661_v31 = vpop.permute.xlu1 %660 }
 0x16c   : > { %v666_v37 = vpop.permute.xlu2 %665 }
 0x182   : > { %v388_v40 = vpop.f32.mrf.mxu0 }
 0x183   : > { %v389_v57 = vadd.f32 %v388_v40, %v332_v47  ;;  %v682_v47 = vstv %s681_s18 }
 0x188   : > { %v404_v38 = vpop.f32.mrf.mxu2 }
 0x189   : > { %v405_v60 = vadd.f32 %v404_v38, %v342_v55 }
 0x18d   : > { %v453_v41 = vpop.f32.mrf.mxu1  ;;  %v396_v45 = vpop.f32.mrf.mxu0 }
 0x18e   : > { %v397_v54 = vadd.f32 %v396_v45, %v337_v53  ;;  %v454_v61 = vadd.f32 %v453_v41, %v389_v57 }
 0x191   : > { %v412_v42 = vpop.f32.mrf.mxu2  ;;  %v461_v44 = vpop.f32.mrf.mxu3 }
 0x192   : > { %v462_v2 = vadd.f32 %v461_v44, %v405_v60  ;;  %v413_v10 = vadd.f32 %v412_v42, %v347_v4 }
 0x195   : > { %v457_v46 = vpop.f32.mrf.mxu1  ;;  %v588_v49 = vpop.f32.mrf.mxu0 }
 0x196   : > { %v458_v58 = vadd.f32 %v457_v46, %v397_v54 }
 0x199   : > { %v495_v43 = vpop.f32.mrf.mxu2  ;;  %v465_v48 = vpop.f32.mrf.mxu3 }
 0x19a   : > { %v496_v0 = vadd.f32 %v495_v43, %v454_v61  ;;  %v466_v17 = vadd.f32 %v465_v48, %v413_v10 }
 0x19d   : > { %v625_v50 = vpop.f32.mrf.mxu1  ;;  %v592_v56 = vpop.f32.mrf.mxu0 }
 0x1a1   : > { %v500_v39 = vpop.f32.mrf.mxu2  ;;  %v537_v51 = vpop.f32.mrf.mxu3 }
 0x1a2   : > { %v501_v62 = vadd.f32 %v500_v39, %v458_v58  ;;  %v538_v3 = vadd.f32 %v537_v51, %v496_v0 }
 0x1a4   : > { %v589_v11 = vadd.f32 %v588_v49, %v538_v3 }
 0x1a5   : > { %v629_v52 = vpop.f32.mrf.mxu1  ;;  %v596_v5 = vpop.f32.mrf.mxu0 }
 0x1a6   : > { %v626_v18 = vadd.f32 %v625_v50, %v589_v11 }
 0x1a8   : > { %v640_v25 = vmax.f32 %v626_v18, 0.0 }
 0x1a9   : > { %v543_v59 = vpop.f32.mrf.mxu3  ;;  %v505_v63 = vpop.f32.mrf.mxu2 }
 0x1aa   : > { %v544_v1 = vadd.f32 %v543_v59, %v501_v62  ;;  %v506_v6 = vadd.f32 %v505_v63, %v462_v2  ;;  %v668_v32 = vmul.f32 %v651_v13, %v640_v25 }
 0x1ac   : > { %v593_v7 = vadd.f32 %v592_v56, %v544_v1 }
 0x1ad   : > { %v633_v9 = vpop.f32.mrf.mxu1  ;;  %v600_v24 = vpop.f32.mrf.mxu0 }
 0x1ae   : > { %v630_v14 = vadd.f32 %v629_v52, %v593_v7 }
 0x1b0   : > { %v641_v21 = vmax.f32 %v630_v14, 0.0 }
 0x1b1   : > { %v549_v8 = vpop.f32.mrf.mxu3  ;;  %v510_v16 = vpop.f32.mrf.mxu2 }
 0x1b2   : > { %v550_v12 = vadd.f32 %v549_v8, %v506_v6  ;;  %v511_v22 = vadd.f32 %v510_v16, %v466_v17  ;;  %v669_v29 = vmul.f32 %v656_v20, %v641_v21 }
 0x1b4   : > { %v597_v15 = vadd.f32 %v596_v5, %v550_v12  ;;  %v672_v35 = vadd.f32 %v669_v29, %v668_v32 }
 0x1b5   : > { %v637_v28 = vpop.f32.mrf.mxu1 }
 0x1b6   : > { %v634_v19 = vadd.f32 %v633_v9, %v597_v15 }
 0x1b8   : > { %v642_v26 = vmax.f32 %v634_v19, 0.0 }
 0x1b9   : > { %v555_v23 = vpop.f32.mrf.mxu3 }
 0x1ba   : > { %v556_v27 = vadd.f32 %v555_v23, %v511_v22  ;;  %v670_v33 = vmul.f32 %v661_v31, %v642_v26 }
 0x1bc   : > { %v601_v30 = vadd.f32 %v600_v24, %v556_v27  ;;  %v673_v38 = vadd.f32 %v672_v35, %v670_v33 }
 0x1be   : > { %v638_v34 = vadd.f32 %v637_v28, %v601_v30 }
 0x1c0   : > { %v643_v36 = vmax.f32 %v638_v34, 0.0 }
 0x1c2   : > { %v671_v40 = vmul.f32 %v666_v37, %v643_v36 }
 0x1c4   : > { %v674_v41 = vadd.f32 %v673_v38, %v671_v40 }
 0x1c6   : > { %v675_v42 = vrot.slane %v674_v41, 4 }
 0x1c8   : > { %v676_v44 = vadd.f32 %v675_v42, %v674_v41 }
 0x1ca   : > { %v677_v45 = vrot.slane %v676_v44, 2 }
 0x1cc   : > { %v678_v46 = vadd.f32 %v677_v45, %v676_v44 }
 0x1ce   : > { %v679_v43 = vrot.slane %v678_v46, 1 }
 0x1d0   : > { %v680_v48 = vadd.f32 %v679_v43, %v678_v46 }
 0x1d2   : > { %v683_v49 = vadd.f32 %v682_v47, %v680_v48 }
 0x1d4   : > { %v778_v50 = vmul.f32 -1.442695, %v683_v49 }
 0x1d6   : > { %834 = vpow2.f32 %v778_v50 }
 0x1dc   : > { %v835_v39 = vpop.eup %834 }
 0x1dd   : > { %v687_v51 = vadd.f32 1.0, %v835_v39 }
 0x1df   : > { %836 = vrcp.f32 %v687_v51  ;;  %v699_v56 = vand.u32 2147483648, %v687_v51  ;;  %v697_v52 = vand.u32 2147483647, %v687_v51  ;;  %vm693_vm5 = vweird.f32 %v687_v51 }
 0x1e1   : > { %v700_v59 = vor.u32 1.1754944e-38, %v699_v56  ;;  %vm698_vm7 = vcmp.eq.f32.partialorder %v697_v52, 8.507059e+37 }
 0x1e5   : > { %v837_v53 = vpop.eup %836 }
 0x1e6   : > { %v689_v54 = vmul.f32 %v837_v53, %v687_v51  ;;  %vm694_vm4 = vweird.f32 %v837_v53 }
 0x1e7   : > { %vm695_vm6 = vmor %vm693_vm5, %vm694_vm4 }
 0x1e8   : > { %v690_v55 = vsub.f32 1.0, %v689_v54 }
 0x1ea   : > { %v691_v57 = vmul.f32 %v837_v53, %v690_v55 }
 0x1ec   : > { %v692_v58 = vadd.f32 %v837_v53, %v691_v57 }
 0x1ee   : > { %v696_v60 = vsel %vm695_vm6, %v837_v53, %v692_v58 }
 0x1ef   : > { %v701_v61 = vsel %vm698_vm7, %v700_v59, %v696_v60 }
 0x1f0   : > { %703 = vst [vmem:[%s230_s6] sm:$0x1] %v701_v61 }
 0x1f1   : > { %865 = shalt.err (!%p862_p3)
}
 0x1f2   : > { %789 = dma.vmem_to_hbm [thread:$0]  (%p974_p5), %s716_s7, 16, %s718_s8, %s705_s9  }
 0x1f3 PF: > { %p795_p4 = scmp.ge.s32.totalorder %s900_s23, 2  ;;  %s729_s16 = sand.u32 1, %s888_s20  }
 0x1f4   : > { %s730_s17 = scalar_lea.sflag [#allocation4], %s729_s16 }
 0x1f5   : > { %p792_p7 = pnand %p795_p4, %p978_p6 }
 0x1f7   : > { %p793_p8 = pneg %p792_p7 }
 0x1f9   : > { %883 = dma.done.wait (%p793_p8), %s730_s17, 16  }
 0x1fa   : > { %885 = vsyncadd (%p793_p8), %s730_s17, 4294967280  ;;  %p16_p9 = scmp.ge.s32.totalorder %s961_s25, 4   ;;  %s1161_s20 = smov %s892_s21 }
 0x1fb   : > { %s1162_s21 = smov %s896_s22  ;;  %s1163_s22 = smov %s972_s28 }
 0x1fc   : > { %s1164_s23 = smov %s961_s25  ;;  %18 = sbr.rel (!%p16_p9) target bundleno = 5 (0x5), region = 75 }
 0x201   :  { %735 = vsyncpa [#allocation4], 1 }
 0x202   :  { %737 = vsyncpa [#allocation4 + $0x1], 1 }

// kernel: _forward.2
= control target key start
LH: loop header
LB: loop body
LE: loop exit
PB: predicated region body
PF: predicated region fallthrough
CT: control target
= control target key end

     0   :  { %s1153_s0 = inlined_call_operand.vmem [shape: f32[1000,32], index: 0, kind: input, shape index: {}]   ;;  %s1154_s1 = inlined_call_operand.vmem [shape: f32[32,32], index: 1, kind: input, shape index: {}]   ;;  %s1155_s2 = inlined_call_operand.vmem [shape: f32[32,1], index: 2, kind: input, shape index: {}]   ;;  %s1156_s3 = inlined_call_operand.vmem [shape: f32[32,1], index: 3, kind: input, shape index: {}]   ;;  %s1157_s4 = inlined_call_operand.<no memory space> [shape: f32[1], index: 4, kind: input, shape index: {}]   ;;  %s1158_s5 = inlined_call_operand.hbm [shape: f32[1,1000], index: 5, kind: output, shape index: {}]  }
   0x1   :  { %10 = sst [smem:[#allocation2]] %s1157_s4 }
   0x2   :  { %11 = vsyncpa [#allocation4], 0 }
   0x3   :  { %13 = vsyncpa [#allocation4 + $0x1], 0  ;;  %s936_s20 = smov 0   ;;  %s938_s21 = smov 0  }
   0x4   :  { %s940_s22 = smov 0   ;;  %s942_s23 = smov 0  }
   0x5 LB: > { %s957_s4 = sadd.s32 4294967295, %s900_s23   ;;  %s772_s24 = sadd.s32 4294967294, %s900_s23   ;;  %s900_s23 = sphi %s942_s23, %s1164_s23   ;;  %s896_s22 = sphi %s940_s22, %s1163_s22   ;;  %s892_s21 = sphi %s938_s21, %s1162_s21   ;;  %s888_s20 = sphi %s936_s20, %s1161_s20  }
   0x6   : > { %s961_s25 = sadd.s32 1, %s900_s23   ;;  %s136_s26 = sadd.s32 1, %s896_s22 }
   0x7   : > { %s133_s27 = ssub.s32 %s900_s23, %s961_s25  ;;  %p146_p0 = scmp.ne.s32.totalorder %s896_s22, %s892_s21 }
   0x8   : > { %p134_p1 = scmp.eq.s32.totalorder %s133_s27, 0  ;;  %p147_p2 = scmp.eq.s32.totalorder %s957_s4, 7 }
   0x9   : > { %p152_p3 = scmp.ne.s32.totalorder %s892_s21, %s888_s20  ;;  %p153_p4 = scmp.eq.s32.totalorder %s772_s24, 7 }
   0xa   : > { %s972_s28 = scalar_select %p134_p1, %s896_s22, %s136_s26  }
   0xb   : > { %p974_p5 = por %p147_p2, %p146_p0  ;;  %p978_p6 = por %p153_p4, %p152_p3 }
   0xc   : > { %p775_p7 = scmp.ge.s32.totalorder %s900_s23, 1  ;;  %p200_p8 = scmp.lt.s32.totalorder %s900_s23, 9 }
   0xe   : > { %p201_p9 = pnand %p775_p7, %p200_p8 }
   0xf   : > { %s776_s6 = sshll.u32 (!%p201_p9), %s957_s4, 4  ;;  %s681_s18 = sld [smem:[#allocation2]] (!%p201_p9) }
  0x10   : > { %204 = sbr.rel (%p201_p9) target bundleno = 499 (0x1f3), region = 40  ;;  %p236_p10 = scmp.lt.s32.totalorder (!%p201_p9), %s776_s6, 124 }
  0x11   : > { %s229_s19 = sand.u32 (!%p201_p9), 1, %s892_s21   ;;  %s713_s27 = scalar_lea.hbm (!%p201_p9), %s1158_s5, %s957_s4 }
  0x12   : > { %s717_s8 = sshll.u32 (!%p201_p9), %s713_s27, 4  ;;  %s705_s9 = scalar_lea.sflag (!%p201_p9), [#allocation4], %s229_s19  ;;  %s718_s8 = int_to_ptr.hbm [resolvable:$true] %s717_s8 }
  0x13   : > { %s852_s4 = sshra.s32 (!%p201_p9), %s718_s8, 4  ;;  %s858_s13 = scalar_lea.hbm (!%p201_p9), %s1158_s5, 8  ;;  %s853_s4 = int_to_ptr.hbm [resolvable:$true] %s852_s4 }
  0x14   : > { %p859_p0 = scmp.lt.s32.totalorder (!%p201_p9), %s853_s4, %s1158_s5 }
  0x15   : > { %s1166_s6 = smov (!%p236_p10, %s776_s6), 124  ;;  %v323_v34 = vld [vmem:[%s1154_s1 + $0x10] sm:$0xff]  ;;  %vm349_vm0 = vcmask 261120   ;;  %v324_v41 = vld [vmem:[%s1154_s1 + $0x18] sm:$0xff]  ;;  %v321_v44 = vld [vmem:[%s1154_s1] sm:$0xff]  ;;  %v902_v48 = vmov 0  }
  0x16   : > { %s777_s7 = sshll.u32 %s1166_s6, 3  ;;  %v357_v36 = vsel %vm349_vm0, %v323_v34, 0  ;;  %v360_v45 = vsel %vm349_vm0, %v324_v41, 0  ;;  %v325_v46 = vld [vmem:[%s1155_s2] sm:$0xff]  ;;  %829 = vset.pattern.permute.xlu1 %v902_v48  ;;  %830 = vset.pattern.permute.xlu2 %v902_v48  ;;  %v351_v49 = vsel %vm349_vm0, %v321_v44, 0  ;;  %v646_v34 = vld [vmem:[%s1156_s3 + $0x10] sm:$0xff] }
  0x17   : > { %s988_s10 = scalar_lea.vmem %s1153_s0, %s777_s7  ;;  %v1010_v39 = vand.u32 4294901760, %v357_v36  ;;  %331 = vperm.xlu1 %829, %v325_v46   ;;  %v1027_v52 = vand.u32 4294901760, %v360_v45  ;;  %v1029_v57 = vand.u32 4294901760, %v351_v49  ;;  %s230_s6 = scalar_lea.vmem [#allocation3], %s229_s19 }
  0x18   : > { %v245_v0 = vld [vmem:[%s988_s10] sm:$0xff]  ;;  %v246_v1 = vld [vmem:[%s988_s10 + $0x8] sm:$0xff]  ;;  %v247_v2 = vld [vmem:[%s988_s10 + $0x10] sm:$0xff]  ;;  %s715_s7 = sshll.u32 %s230_s6, 4  ;;  %s716_s7 = int_to_ptr.vmem [resolvable:$true] %s715_s7 }
  0x19   : > { %261 = vxpose.xlu0.b32.start [1/16] (narrow) %v245_v0, 32  ;;  %v248_v3 = vld [vmem:[%s988_s10 + $0x18] sm:$0xff]  ;;  %v249_v4 = vld [vmem:[%s988_s10 + $0x20] sm:$0xff]  ;;  %v250_v5 = vld [vmem:[%s988_s10 + $0x28] sm:$0xff]  ;;  %v1016_v43 = vsub.f32 %v357_v36, %v1010_v39  ;;  %v1043_v63 = vsub.f32 %v360_v45, %v1027_v52 }
  0x1a   : > { %v251_v6 = vld [vmem:[%s988_s10 + $0x30] sm:$0xff]  ;;  %v252_v7 = vld [vmem:[%s988_s10 + $0x38] sm:$0xff]  ;;  %v253_v8 = vld [vmem:[%s988_s10 + $0x40] sm:$0xff] }
  0x1b   : > { %v254_v9 = vld [vmem:[%s988_s10 + $0x48] sm:$0xff]  ;;  %v255_v10 = vld [vmem:[%s988_s10 + $0x50] sm:$0xff]  ;;  %v256_v11 = vld [vmem:[%s988_s10 + $0x58] sm:$0xff]  ;;  %v400_v51 = vand.u32 4294901760, %v1016_v43 }
  0x1c   : > { %v257_v12 = vld [vmem:[%s988_s10 + $0x60] sm:$0xff]  ;;  %v258_v13 = vld [vmem:[%s988_s10 + $0x68] sm:$0xff]  ;;  %v259_v14 = vld [vmem:[%s988_s10 + $0x70] sm:$0xff] }
  0x1d   : > { %v260_v15 = vld [vmem:[%s988_s10 + $0x78] sm:$0xff]  ;;  %v401_v62 = vsub.f32 %v1016_v43, %v400_v51  ;;  %v322_v0 = vld [vmem:[%s1154_s1 + $0x8] sm:$0xff]  ;;  %s854_s10 = scalar_lea.hbm %s853_s4, 1 }
  0x1e   : > { %v645_v36 = vld [vmem:[%s1156_s3 + $0x8] sm:$0xff]  ;;  %p855_p11 = scmp.ne.s32.totalorder %s853_s4, %s854_s10  ;;  %p860_p1 = scmp.lt.s32.totalorder %s858_s13, %s854_s10 }
  0x20   : > { %p856_p12 = pnand %p855_p11, %p974_p5  ;;  %p861_p2 = por %p860_p1, %p859_p0 }
  0x21   : > { %262 = vxpose.xlu0.b32.cont [2/16] (narrow) %v246_v1, 32 }
  0x22   : > { %p857_p13 = pneg %p856_p12 }
  0x24   : > { %p862_p3 = pnand %p861_p2, %p857_p13 }
  0x29   : > { %263 = vxpose.xlu0.b32.cont [3/16] (narrow) %v247_v2, 32 }
  0x31   : > { %264 = vxpose.xlu0.b32.cont [4/16] (narrow) %v248_v3, 32 }
  0x39   : > { %265 = vxpose.xlu0.b32.cont [5/16] (narrow) %v249_v4, 32  ;;  %v326_v4 = vld [vmem:[%s1155_s2 + $0x8] sm:$0xff] }
  0x3a   : > { %336 = vperm.xlu1 %829, %v326_v4  }
  0x41   : > { %266 = vxpose.xlu0.b32.cont [6/16] (narrow) %v250_v5, 32 }
  0x49   : > { %267 = vxpose.xlu0.b32.cont [7/16] (narrow) %v251_v6, 32  ;;  %v1058_v6 = vsub.f32 %v351_v49, %v1029_v57 }
  0x51   : > { %268 = vxpose.xlu0.b32.cont [8/16] (narrow) %v252_v7, 32 }
  0x59   : > { %269 = vxpose.xlu0.b32.cont [9/16] (narrow) %v253_v8, 32 }
  0x61   : > { %270 = vxpose.xlu0.b32.cont [10/16] (narrow) %v254_v9, 32 }
  0x69   : > { %271 = vxpose.xlu0.b32.cont [11/16] (narrow) %v255_v10, 32  ;;  %v354_v10 = vsel %vm349_vm0, %v322_v0, 0 }
  0x71   : > { %272 = vxpose.xlu0.b32.cont [12/16] (narrow) %v256_v11, 32  ;;  %v402_v11 = vand.u32 4294901760, %v401_v62 }
  0x79   : > { %273 = vxpose.xlu0.b32.cont [13/16] (narrow) %v257_v12, 32  ;;  %v408_v12 = vand.u32 4294901760, %v1043_v63 }
  0x81   : > { %274 = vxpose.xlu0.b32.cont [14/16] (narrow) %v258_v13, 32 }
  0x89   : > { %275 = vxpose.xlu0.b32.cont [15/16] (narrow) %v259_v14, 32 }
  0x91   : > { %276 = vxpose.xlu0.b32.end [16/16] (narrow) %v260_v15, 32 }
  0xbd   : > { %v277_v16 = vpop.trf.xlu0 }
  0xbe   : > { %v293_v20 = vmul.f32 %v277_v16, %v277_v16 }
  0xc5   : > { %v278_v17 = vpop.trf.xlu0 }
  0xc6   : > { %v294_v19 = vmul.f32 %v278_v17, %v278_v17 }
  0xc8   : > { %v297_v22 = vadd.f32 %v294_v19, %v293_v20  ;;  %v409_v20 = vsub.f32 %v1043_v63, %v408_v12 }
  0xcd   : > { %v279_v18 = vpop.trf.xlu0 }
  0xce   : > { %v295_v21 = vmul.f32 %v279_v18, %v279_v18 }
  0xd0   : > { %v298_v24 = vadd.f32 %v297_v22, %v295_v21 }
  0xd5   : > { %v280_v23 = vpop.trf.xlu0 }
  0xd6   : > { %v296_v25 = vmul.f32 %v280_v23, %v280_v23 }
  0xd8   : > { %v299_v26 = vadd.f32 %v298_v24, %v296_v25 }
  0xda   : > { %v300_v27 = vrot.slane %v299_v26, 4 }
  0xdc   : > { %v301_v28 = vadd.f32 %v300_v27, %v299_v26  ;;  %v410_v26 = vand.u32 4294901760, %v409_v20 }
  0xde   : > { %v302_v29 = vrot.slane %v301_v28, 2 }
  0xe0   : > { %v303_v30 = vadd.f32 %v302_v29, %v301_v28 }
  0xe2   : > { %v304_v31 = vrot.slane %v303_v30, 1 }
  0xe4   : > { %v305_v32 = vadd.f32 %v304_v31, %v303_v30  ;;  %v644_v30 = vld [vmem:[%s1156_s3] sm:$0xff] }
  0xe5   : > { %650 = vperm.xlu1 %829, %v644_v30  }
  0xe6   : > { %v306_v33 = vmax.f32 %v305_v32, 1e-24  ;;  %v327_v32 = vld [vmem:[%s1155_s2 + $0x10] sm:$0xff] }
  0xe7   : > { %341 = vperm.xlu2 %830, %v327_v32  }
  0xe8   : > { %832 = vrsqrt.f32 %v306_v33  ;;  %vm313_vm2 = vweird.f32 %v306_v33 }
  0xed   : > { %660 = vperm.xlu1 %829, %v646_v34  }
  0xee   : > { %v833_v35 = vpop.eup %832 }
  0xef   : > { %v308_v37 = vmul.f32 %v833_v35, %v306_v33  ;;  %vm314_vm1 = vweird.f32 %v833_v35 }
  0xf0   : > { %vm315_vm3 = vmor %vm313_vm2, %vm314_vm1 }
  0xf1   : > { %v309_v38 = vmul.f32 %v833_v35, %v308_v37  ;;  %v647_v37 = vld [vmem:[%s1156_s3 + $0x18] sm:$0xff] }
  0xf3   : > { %v310_v40 = vmul.f32 0.5, %v309_v38 }
  0xf5   : > { %v311_v42 = vsub.f32 1.5, %v310_v40 }
  0xf7   : > { %v312_v47 = vmul.f32 %v833_v35, %v311_v42 }
  0xf8   : > { %831 = vset.pattern.permute.xlu0 %v902_v48 }
  0xf9   : > { %v316_v50 = vsel %vm315_vm3, %v833_v35, %v312_v47  ;;  %v328_v35 = vld [vmem:[%s1155_s2 + $0x18] sm:$0xff]  ;;  %v332_v47 = vpop.permute.xlu1 %331 }
  0xfa   : > { %v317_v53 = vmul.f32 %v316_v50, %v277_v16  ;;  %v318_v54 = vmul.f32 %v316_v50, %v278_v17  ;;  %v319_v55 = vmul.f32 %v316_v50, %v279_v18  ;;  %v320_v56 = vmul.f32 %v316_v50, %v280_v23  ;;  %346 = vperm.xlu2 %830, %v328_v35  }
  0xfb   : > { %v384_v16 = vand.u32 4294901760, %v1058_v6  ;;  %v1067_v17 = vand.u32 4294901760, %v354_v10 }
  0xfc   : > { %v1031_v58 = vand.u32 4294901760, %v320_v56  ;;  %v1033_v59 = vand.u32 4294901760, %v319_v55  ;;  %v1035_v60 = vand.u32 4294901760, %v318_v54  ;;  %v1037_v61 = vand.u32 4294901760, %v317_v53 }
  0xfd   : > { %v385_v23 = vsub.f32 %v1058_v6, %v384_v16  ;;  %v391_v24 = vsub.f32 %v354_v10, %v1067_v17 }
  0xfe   : > { %v428_v1 = vsub.f32 %v320_v56, %v1031_v58  ;;  %375 = vmatpush.msra.mxu0 %v1031_v58  ;;  %781 = vmatpush.msra.mxu2 %v1031_v58  ;;  %v434_v2 = vsub.f32 %v319_v55, %v1033_v59  ;;  %v440_v3 = vsub.f32 %v318_v54, %v1035_v60 }
  0xff   : > { %v446_v5 = vsub.f32 %v317_v53, %v1037_v61  ;;  %v386_v28 = vand.u32 4294901760, %v385_v23  ;;  %v392_v29 = vand.u32 4294901760, %v391_v24 }
 0x100   : > { %377 = vmatpush.msra.mxu0 %v1033_v59  ;;  %782 = vmatpush.msra.mxu2 %v1033_v59  ;;  %v429_v7 = vand.u32 4294901760, %v428_v1  ;;  %v435_v8 = vand.u32 4294901760, %v434_v2  ;;  %v441_v9 = vand.u32 4294901760, %v440_v3 }
 0x101   : > { %v447_v15 = vand.u32 4294901760, %v446_v5  ;;  %v393_v31 = vsub.f32 %v391_v24, %v392_v29  ;;  %v337_v53 = vpop.permute.xlu1 %336 }
 0x102   : > { %379 = vmatpush.msra.mxu0 %v1035_v60  ;;  %783 = vmatpush.msra.mxu2 %v1035_v60  ;;  %v430_v13 = vsub.f32 %v428_v1, %v429_v7  ;;  %v436_v14 = vsub.f32 %v434_v2, %v435_v8  ;;  %v442_v19 = vsub.f32 %v440_v3, %v441_v9 }
 0x103   : > { %v448_v22 = vsub.f32 %v446_v5, %v447_v15  ;;  %v394_v33 = vand.u32 4294901760, %v393_v31  ;;  %655 = vperm.xlu2 %830, %v645_v36  }
 0x104   : > { %381 = vmatpush.msra.mxu0 %v1037_v61  ;;  %784 = vmatpush.msra.mxu2 %v1037_v61  ;;  %v431_v18 = vand.u32 4294901760, %v430_v13  ;;  %v437_v21 = vand.u32 4294901760, %v436_v14  ;;  %v443_v25 = vand.u32 4294901760, %v442_v19 }
 0x105   : > { %403 = vmatmul.f32.vlgmr.msra.gmra.mxu2 %v402_v11  ;;  %v449_v27 = vand.u32 4294901760, %v448_v22  ;;  %387 = vmatmul.f32.vlgmr.msra.gmra.mxu0 %v386_v28 }
 0x106   : > { %573 = vmatpush.msrb.mxu0 %v429_v7  ;;  %482 = vmatpush.msrb.mxu2 %v428_v1 }
 0x107   : > { %432 = vmatpush.msra.mxu1 %v431_v18  ;;  %785 = vmatpush.msra.mxu3 %v431_v18 }
 0x108   : > { %577 = vmatpush.msrb.mxu0 %v435_v8  ;;  %485 = vmatpush.msrb.mxu2 %v434_v2 }
 0x109   : > { %438 = vmatpush.msra.mxu1 %v437_v21  ;;  %786 = vmatpush.msra.mxu3 %v437_v21 }
 0x10a   : > { %581 = vmatpush.msrb.mxu0 %v441_v9  ;;  %488 = vmatpush.msrb.mxu2 %v440_v3 }
 0x10b   : > { %444 = vmatpush.msra.mxu1 %v443_v25  ;;  %787 = vmatpush.msra.mxu3 %v443_v25 }
 0x10c   : > { %585 = vmatpush.msrb.mxu0 %v447_v15  ;;  %491 = vmatpush.msrb.mxu2 %v446_v5 }
 0x10d   : > { %450 = vmatpush.msra.mxu1 %v449_v27  ;;  %788 = vmatpush.msra.mxu3 %v449_v27 }
 0x10e   : > { %411 = vmatmul.f32.gmra.mxu2 %v410_v26  ;;  %460 = vmatmul.f32.vlgmr.msra.gmra.mxu3 %v1010_v39 }
 0x10f   : > { %616 = vmatpush.msrb.mxu1 %v1031_v58  ;;  %526 = vmatpush.msrb.mxu3 %v1031_v58 }
 0x110   : > { %452 = vmatmul.f32.vlgmr.msra.gmra.mxu1 %v1029_v57  ;;  %395 = vmatmul.f32.gmra.mxu0 %v394_v33 }
 0x111   : > { %618 = vmatpush.msrb.mxu1 %v1033_v59  ;;  %528 = vmatpush.msrb.mxu3 %v1033_v59 }
 0x112   : > { %665 = vperm.xlu2 %830, %v647_v37  }
 0x113   : > { %620 = vmatpush.msrb.mxu1 %v1035_v60  ;;  %530 = vmatpush.msrb.mxu3 %v1035_v60 }
 0x115   : > { %622 = vmatpush.msrb.mxu1 %v1037_v61  ;;  %532 = vmatpush.msrb.mxu3 %v1037_v61 }
 0x116   : > { %494 = vmatmul.f32.vlgmr.msrb.gmra.mxu2 %v1058_v6  ;;  %464 = vmatmul.f32.gmra.mxu3 %v1027_v52 }
 0x118   : > { %456 = vmatmul.f32.gmra.mxu1 %v1067_v17  ;;  %587 = vmatmul.f32.vlgmr.msrb.gmra.mxu0 %v1029_v57 }
 0x11e   : > { %499 = vmatmul.f32.gmra.mxu2 %v391_v24  ;;  %536 = vmatmul.f32.vlgmr.msrb.gmra.mxu3 %v384_v16 }
 0x120   : > { %624 = vmatmul.f32.vlgmr.msrb.gmra.mxu1 %v1029_v57  ;;  %591 = vmatmul.f32.gmra.mxu0 %v1067_v17 }
 0x126   : > { %504 = vmatmul.f32.gmra.mxu2 %v1016_v43  ;;  %542 = vmatmul.f32.gmra.mxu3 %v392_v29 }
 0x128   : > { %628 = vmatmul.f32.gmra.mxu1 %v1067_v17  ;;  %595 = vmatmul.f32.gmra.mxu0 %v1010_v39 }
 0x12e   : > { %509 = vmatmul.f32.gmra.mxu2 %v1043_v63  ;;  %548 = vmatmul.f32.gmra.mxu3 %v400_v51 }
 0x130   : > { %632 = vmatmul.f32.gmra.mxu1 %v1010_v39  ;;  %599 = vmatmul.f32.gmra.mxu0 %v1027_v52 }
 0x136   : > { %554 = vmatmul.f32.gmra.mxu3 %v408_v12 }
 0x138   : > { %636 = vmatmul.f32.gmra.mxu1 %v1027_v52 }
 0x141   : > { %v342_v55 = vpop.permute.xlu2 %341 }
 0x154   : > { %v347_v4 = vpop.permute.xlu2 %346 }
 0x157   : > { %v651_v13 = vpop.permute.xlu1 %650 }
 0x15d   : > { %v656_v20 = vpop.permute.xlu2 %655 }
 0x15f   : > { %v661_v31 = vpop.permute.xlu1 %660 }
 0x16c   : > { %v666_v37 = vpop.permute.xlu2 %665 }
 0x182   : > { %v388_v40 = vpop.f32.mrf.mxu0 }
 0x183   : > { %v389_v57 = vadd.f32 %v388_v40, %v332_v47  ;;  %v682_v47 = vstv %s681_s18 }
 0x188   : > { %v404_v38 = vpop.f32.mrf.mxu2 }
 0x189   : > { %v405_v60 = vadd.f32 %v404_v38, %v342_v55 }
 0x18d   : > { %v453_v41 = vpop.f32.mrf.mxu1  ;;  %v396_v45 = vpop.f32.mrf.mxu0 }
 0x18e   : > { %v397_v54 = vadd.f32 %v396_v45, %v337_v53  ;;  %v454_v61 = vadd.f32 %v453_v41, %v389_v57 }
 0x191   : > { %v412_v42 = vpop.f32.mrf.mxu2  ;;  %v461_v44 = vpop.f32.mrf.mxu3 }
 0x192   : > { %v462_v2 = vadd.f32 %v461_v44, %v405_v60  ;;  %v413_v10 = vadd.f32 %v412_v42, %v347_v4 }
 0x195   : > { %v457_v46 = vpop.f32.mrf.mxu1  ;;  %v588_v49 = vpop.f32.mrf.mxu0 }
 0x196   : > { %v458_v58 = vadd.f32 %v457_v46, %v397_v54 }
 0x199   : > { %v495_v43 = vpop.f32.mrf.mxu2  ;;  %v465_v48 = vpop.f32.mrf.mxu3 }
 0x19a   : > { %v496_v0 = vadd.f32 %v495_v43, %v454_v61  ;;  %v466_v17 = vadd.f32 %v465_v48, %v413_v10 }
 0x19d   : > { %v625_v50 = vpop.f32.mrf.mxu1  ;;  %v592_v56 = vpop.f32.mrf.mxu0 }
 0x1a1   : > { %v500_v39 = vpop.f32.mrf.mxu2  ;;  %v537_v51 = vpop.f32.mrf.mxu3 }
 0x1a2   : > { %v501_v62 = vadd.f32 %v500_v39, %v458_v58  ;;  %v538_v3 = vadd.f32 %v537_v51, %v496_v0 }
 0x1a4   : > { %v589_v11 = vadd.f32 %v588_v49, %v538_v3 }
 0x1a5   : > { %v629_v52 = vpop.f32.mrf.mxu1  ;;  %v596_v5 = vpop.f32.mrf.mxu0 }
 0x1a6   : > { %v626_v18 = vadd.f32 %v625_v50, %v589_v11 }
 0x1a8   : > { %v640_v25 = vmax.f32 %v626_v18, 0.0 }
 0x1a9   : > { %v543_v59 = vpop.f32.mrf.mxu3  ;;  %v505_v63 = vpop.f32.mrf.mxu2 }
 0x1aa   : > { %v544_v1 = vadd.f32 %v543_v59, %v501_v62  ;;  %v506_v6 = vadd.f32 %v505_v63, %v462_v2  ;;  %v668_v32 = vmul.f32 %v651_v13, %v640_v25 }
 0x1ac   : > { %v593_v7 = vadd.f32 %v592_v56, %v544_v1 }
 0x1ad   : > { %v633_v9 = vpop.f32.mrf.mxu1  ;;  %v600_v24 = vpop.f32.mrf.mxu0 }
 0x1ae   : > { %v630_v14 = vadd.f32 %v629_v52, %v593_v7 }
 0x1b0   : > { %v641_v21 = vmax.f32 %v630_v14, 0.0 }
 0x1b1   : > { %v549_v8 = vpop.f32.mrf.mxu3  ;;  %v510_v16 = vpop.f32.mrf.mxu2 }
 0x1b2   : > { %v550_v12 = vadd.f32 %v549_v8, %v506_v6  ;;  %v511_v22 = vadd.f32 %v510_v16, %v466_v17  ;;  %v669_v29 = vmul.f32 %v656_v20, %v641_v21 }
 0x1b4   : > { %v597_v15 = vadd.f32 %v596_v5, %v550_v12  ;;  %v672_v35 = vadd.f32 %v669_v29, %v668_v32 }
 0x1b5   : > { %v637_v28 = vpop.f32.mrf.mxu1 }
 0x1b6   : > { %v634_v19 = vadd.f32 %v633_v9, %v597_v15 }
 0x1b8   : > { %v642_v26 = vmax.f32 %v634_v19, 0.0 }
 0x1b9   : > { %v555_v23 = vpop.f32.mrf.mxu3 }
 0x1ba   : > { %v556_v27 = vadd.f32 %v555_v23, %v511_v22  ;;  %v670_v33 = vmul.f32 %v661_v31, %v642_v26 }
 0x1bc   : > { %v601_v30 = vadd.f32 %v600_v24, %v556_v27  ;;  %v673_v38 = vadd.f32 %v672_v35, %v670_v33 }
 0x1be   : > { %v638_v34 = vadd.f32 %v637_v28, %v601_v30 }
 0x1c0   : > { %v643_v36 = vmax.f32 %v638_v34, 0.0 }
 0x1c2   : > { %v671_v40 = vmul.f32 %v666_v37, %v643_v36 }
 0x1c4   : > { %v674_v41 = vadd.f32 %v673_v38, %v671_v40 }
 0x1c6   : > { %v675_v42 = vrot.slane %v674_v41, 4 }
 0x1c8   : > { %v676_v44 = vadd.f32 %v675_v42, %v674_v41 }
 0x1ca   : > { %v677_v45 = vrot.slane %v676_v44, 2 }
 0x1cc   : > { %v678_v46 = vadd.f32 %v677_v45, %v676_v44 }
 0x1ce   : > { %v679_v43 = vrot.slane %v678_v46, 1 }
 0x1d0   : > { %v680_v48 = vadd.f32 %v679_v43, %v678_v46 }
 0x1d2   : > { %v683_v49 = vadd.f32 %v682_v47, %v680_v48 }
 0x1d4   : > { %v778_v50 = vmul.f32 -1.442695, %v683_v49 }
 0x1d6   : > { %834 = vpow2.f32 %v778_v50 }
 0x1dc   : > { %v835_v39 = vpop.eup %834 }
 0x1dd   : > { %v687_v51 = vadd.f32 1.0, %v835_v39 }
 0x1df   : > { %836 = vrcp.f32 %v687_v51  ;;  %v699_v56 = vand.u32 2147483648, %v687_v51  ;;  %v697_v52 = vand.u32 2147483647, %v687_v51  ;;  %vm693_vm5 = vweird.f32 %v687_v51 }
 0x1e1   : > { %v700_v59 = vor.u32 1.1754944e-38, %v699_v56  ;;  %vm698_vm7 = vcmp.eq.f32.partialorder %v697_v52, 8.507059e+37 }
 0x1e5   : > { %v837_v53 = vpop.eup %836 }
 0x1e6   : > { %v689_v54 = vmul.f32 %v837_v53, %v687_v51  ;;  %vm694_vm4 = vweird.f32 %v837_v53 }
 0x1e7   : > { %vm695_vm6 = vmor %vm693_vm5, %vm694_vm4 }
 0x1e8   : > { %v690_v55 = vsub.f32 1.0, %v689_v54 }
 0x1ea   : > { %v691_v57 = vmul.f32 %v837_v53, %v690_v55 }
 0x1ec   : > { %v692_v58 = vadd.f32 %v837_v53, %v691_v57 }
 0x1ee   : > { %v696_v60 = vsel %vm695_vm6, %v837_v53, %v692_v58 }
 0x1ef   : > { %v701_v61 = vsel %vm698_vm7, %v700_v59, %v696_v60 }
 0x1f0   : > { %703 = vst [vmem:[%s230_s6] sm:$0x1] %v701_v61 }
 0x1f1   : > { %865 = shalt.err (!%p862_p3)
}
 0x1f2   : > { %789 = dma.vmem_to_hbm [thread:$0]  (%p974_p5), %s716_s7, 16, %s718_s8, %s705_s9  }
 0x1f3 PF: > { %p795_p4 = scmp.ge.s32.totalorder %s900_s23, 2  ;;  %s729_s16 = sand.u32 1, %s888_s20  }
 0x1f4   : > { %s730_s17 = scalar_lea.sflag [#allocation4], %s729_s16 }
 0x1f5   : > { %p792_p7 = pnand %p795_p4, %p978_p6 }
 0x1f7   : > { %p793_p8 = pneg %p792_p7 }
 0x1f9   : > { %883 = dma.done.wait (%p793_p8), %s730_s17, 16  }
 0x1fa   : > { %885 = vsyncadd (%p793_p8), %s730_s17, 4294967280  ;;  %p16_p9 = scmp.ge.s32.totalorder %s961_s25, 10   ;;  %s1161_s20 = smov %s892_s21 }
 0x1fb   : > { %s1162_s21 = smov %s896_s22  ;;  %s1163_s22 = smov %s972_s28 }
 0x1fc   : > { %s1164_s23 = smov %s961_s25  ;;  %18 = sbr.rel (!%p16_p9) target bundleno = 5 (0x5), region = 75 }
 0x201   :  { %735 = vsyncpa [#allocation4], 1 }
 0x202   :  { %737 = vsyncpa [#allocation4 + $0x1], 1 }

</bundles_post_ra>
